<compile_context>
chip_gen: v5e
topology: v5e:2x2
jax: 0.10.0
libtpu: 0.0.40
codegen_flags: <defaults>
</compile_context>

<pallas_src>
import functools

import jax
import jax.numpy as jnp
from jax.experimental import pallas as pl
from jax.experimental.pallas import tpu as pltpu

LANE = 128
SUBLANE = 8
NEG_SLOPE = 0.1


def _round_up(n, m):
    return ((n + m - 1) // m) * m


# ----------------------------------------------------------------------------
# Fused kernel: (Linear + LeakyReLU) * L  ->  single concatenated head matmul
# ----------------------------------------------------------------------------
def _make_fused_kernel(num_hidden_layers):
    def kernel(*refs):
        # refs = (x, w0, b0, w1, b1, ..., w_head, b_head, out)
        x_ref = refs[0]
        out_ref = refs[-1]

        h = x_ref[...]
        idx = 1
        for _ in range(num_hidden_layers):
            w = refs[idx][...]
            b = refs[idx + 1][...]          # (1, out_pad) -> broadcasts over batch
            idx += 2
            y = jnp.dot(h, w, preferred_element_type=jnp.float32) + b
            # LeakyReLU(0.1): max(y, 0.1*y) == where(y>0, y, 0.1*y) exactly.
            h = jnp.maximum(y, NEG_SLOPE * y)

        w_head = refs[idx][...]             # (hidden_pad, 2*latent padded)
        b_head = refs[idx + 1][...]
        out = jnp.dot(h, w_head, preferred_element_type=jnp.float32) + b_head
        out_ref[...] = out.astype(out_ref.dtype)

    return kernel


# ----------------------------------------------------------------------------
# Parameter init (mirrors nn.Linear init shapes, deterministic)
# ----------------------------------------------------------------------------
def init_params(key, layer_sizes, latent_size, dtype=jnp.float32):
    params = {"mlp": []}
    for in_size, out_size in zip(layer_sizes[:-1], layer_sizes[1:]):
        key, kw, kb = jax.random.split(key, 3)
        scale = 1.0 / jnp.sqrt(in_size)
        w = jax.random.uniform(kw, (in_size, out_size), dtype, -scale, scale)
        b = jax.random.uniform(kb, (1, out_size), dtype, -scale, scale)
        params["mlp"].append((w, b))

    hidden = layer_sizes[-1]
    scale = 1.0 / jnp.sqrt(hidden)
    key, kwm, kbm, kwv, kbv = jax.random.split(key, 5)
    params["wm"] = jax.random.uniform(kwm, (hidden, latent_size), dtype, -scale, scale)
    params["bm"] = jax.random.uniform(kbm, (1, latent_size), dtype, -scale, scale)
    params["wv"] = jax.random.uniform(kwv, (hidden, latent_size), dtype, -scale, scale)
    params["bv"] = jax.random.uniform(kbv, (1, latent_size), dtype, -scale, scale)
    return params


# ----------------------------------------------------------------------------
# One-time packing: pad to lane-dense shapes, concat the two heads
# ----------------------------------------------------------------------------
def pack_params(params):
    packed = {"mlp": []}
    for w, b in params["mlp"]:
        in_p = _round_up(w.shape[0], LANE)
        out_p = _round_up(w.shape[1], LANE)
        wp = jnp.zeros((in_p, out_p), w.dtype).at[: w.shape[0], : w.shape[1]].set(w)
        bp = jnp.zeros((1, out_p), b.dtype).at[:, : b.shape[1]].set(b)
        packed["mlp"].append((wp, bp))

    wm, bm, wv, bv = params["wm"], params["bm"], params["wv"], params["bv"]
    hidden, latent = wm.shape
    w_head = jnp.concatenate([wm, wv], axis=1)   # (hidden, 2*latent)
    b_head = jnp.concatenate([bm, bv], axis=1)   # (1, 2*latent)
    in_p = _round_up(hidden, LANE)
    out_p = _round_up(2 * latent, LANE)
    packed["w_head"] = (
        jnp.zeros((in_p, out_p), w_head.dtype).at[:hidden, : 2 * latent].set(w_head)
    )
    packed["b_head"] = (
        jnp.zeros((1, out_p), b_head.dtype).at[:, : 2 * latent].set(b_head)
    )
    packed["latent"] = int(latent)               # python int (static)
    return packed


# ----------------------------------------------------------------------------
# Fused forward (single pallas_call, jit'd)
# ----------------------------------------------------------------------------
@functools.partial(jax.jit, static_argnums=(2,))
def _fused_forward(x, weights, latent):
    B, F = x.shape
    B_pad = _round_up(B, SUBLANE)
    F_pad = weights[0].shape[0]                  # padded input feature dim
    x_pad = jnp.zeros((B_pad, F_pad), x.dtype).at[:B, :F].set(x)

    num_hidden = (len(weights) - 2) // 2
    out_pad = weights[-1].shape[1]

    out = pl.pallas_call(
        _make_fused_kernel(num_hidden),
        out_shape=jax.ShapeDtypeStruct((B_pad, out_pad), x.dtype),
        in_specs=[pl.BlockSpec(memory_space=pltpu.VMEM)] * (1 + len(weights)),
        out_specs=pl.BlockSpec(memory_space=pltpu.VMEM),
    )(x_pad, *weights)

    means = out[:B, :latent]
    log_vars = out[:B, latent : 2 * latent]
    return means, log_vars


def engen_vae_encoder(packed, x):
    weights = []
    for w, b in packed["mlp"]:
        weights.extend((w, b))
    weights.extend((packed["w_head"], packed["b_head"]))
    return _fused_forward(x, tuple(weights), packed["latent"])


# ----------------------------------------------------------------------------
# Pure-JAX reference (unpadded params) for correctness check
# ----------------------------------------------------------------------------
def reference(params, x):
    h = x
    for w, b in params["mlp"]:
        y = h @ w + b
        h = jnp.where(y > 0, y, NEG_SLOPE * y)
    return h @ params["wm"] + params["bm"], h @ params["wv"] + params["bv"]


if __name__ == "__main__":
    key = jax.random.PRNGKey(0)
    layer_sizes = [64, 128, 64]   # MLP: 64 -> 128 -> 64 (Linear + LeakyReLU each)
    latent_size = 32
    batch = 8

    kp, kx = jax.random.split(key)
    params = init_params(kp, layer_sizes, latent_size)
    packed = pack_params(params)
    x = jax.random.normal(kx, (batch, layer_sizes[0]), jnp.float32)

    means, log_vars = engen_vae_encoder(packed, x)
    means = jax.block_until_ready(means)
    log_vars = jax.block_until_ready(log_vars)

    ref_m, ref_v = reference(params, x)
    assert means.shape == (batch, latent_size)
    assert log_vars.shape == (batch, latent_size)
    assert jnp.allclose(means, ref_m, atol=1e-5, rtol=1e-5)
    assert jnp.allclose(log_vars, ref_v, atol=1e-5, rtol=1e-5)

    print("KERNEL_OK")
</pallas_src>

<mosaic_0001>
module attributes {stable_mosaic.version = 11 : i64} {
  func.func @kernel(%arg0: memref<8x128xf32, #tpu.memory_space<vmem>>, %arg1: memref<128x128xf32, #tpu.memory_space<vmem>>, %arg2: memref<1x128xf32, #tpu.memory_space<vmem>>, %arg3: memref<128x128xf32, #tpu.memory_space<vmem>>, %arg4: memref<1x128xf32, #tpu.memory_space<vmem>>, %arg5: memref<128x128xf32, #tpu.memory_space<vmem>>, %arg6: memref<1x128xf32, #tpu.memory_space<vmem>>, %arg7: memref<8x128xf32, #tpu.memory_space<vmem>>) attributes {dimension_semantics = [], scalar_prefetch = 0 : i64, scratch_operands = 0 : i64, tpu.core_type = #tpu.core_type<tc>} {
    %c0 = arith.constant 0 : index
    %c0_0 = arith.constant 0 : index
    %0 = vector.load %arg0[%c0, %c0_0] : memref<8x128xf32, #tpu.memory_space<vmem>>, vector<8x128xf32>
    %c0_1 = arith.constant 0 : index
    %c0_2 = arith.constant 0 : index
    %1 = vector.load %arg1[%c0_1, %c0_2] : memref<128x128xf32, #tpu.memory_space<vmem>>, vector<128x128xf32>
    %c0_3 = arith.constant 0 : index
    %c0_4 = arith.constant 0 : index
    %2 = vector.load %arg2[%c0_3, %c0_4] : memref<1x128xf32, #tpu.memory_space<vmem>>, vector<1x128xf32>
    %cst = arith.constant dense<0.000000e+00> : vector<8x128xf32>
    %3 = tpu.matmul %0, %1, %cst {dimension_numbers = #tpu.dot_dimension_numbers<[1], [0], [0], [1], [0, 0, 1, 1], [], []>} : vector<8x128xf32>, vector<128x128xf32>, vector<8x128xf32> -> vector<8x128xf32>
    %4 = vector.broadcast %2 : vector<1x128xf32> to vector<8x128xf32>
    %5 = arith.addf %3, %4 : vector<8x128xf32>
    %cst_5 = arith.constant 1.000000e-01 : f32
    %6 = vector.broadcast %cst_5 : f32 to vector<8x128xf32>
    %7 = arith.mulf %6, %5 : vector<8x128xf32>
    %8 = arith.maximumf %5, %7 : vector<8x128xf32>
    %c0_6 = arith.constant 0 : index
    %c0_7 = arith.constant 0 : index
    %9 = vector.load %arg3[%c0_6, %c0_7] : memref<128x128xf32, #tpu.memory_space<vmem>>, vector<128x128xf32>
    %c0_8 = arith.constant 0 : index
    %c0_9 = arith.constant 0 : index
    %10 = vector.load %arg4[%c0_8, %c0_9] : memref<1x128xf32, #tpu.memory_space<vmem>>, vector<1x128xf32>
    %cst_10 = arith.constant dense<0.000000e+00> : vector<8x128xf32>
    %11 = tpu.matmul %8, %9, %cst_10 {dimension_numbers = #tpu.dot_dimension_numbers<[1], [0], [0], [1], [0, 0, 1, 1], [], []>} : vector<8x128xf32>, vector<128x128xf32>, vector<8x128xf32> -> vector<8x128xf32>
    %12 = vector.broadcast %10 : vector<1x128xf32> to vector<8x128xf32>
    %13 = arith.addf %11, %12 : vector<8x128xf32>
    %cst_11 = arith.constant 1.000000e-01 : f32
    %14 = vector.broadcast %cst_11 : f32 to vector<8x128xf32>
    %15 = arith.mulf %14, %13 : vector<8x128xf32>
    %16 = arith.maximumf %13, %15 : vector<8x128xf32>
    %c0_12 = arith.constant 0 : index
    %c0_13 = arith.constant 0 : index
    %17 = vector.load %arg5[%c0_12, %c0_13] : memref<128x128xf32, #tpu.memory_space<vmem>>, vector<128x128xf32>
    %c0_14 = arith.constant 0 : index
    %c0_15 = arith.constant 0 : index
    %18 = vector.load %arg6[%c0_14, %c0_15] : memref<1x128xf32, #tpu.memory_space<vmem>>, vector<1x128xf32>
    %cst_16 = arith.constant dense<0.000000e+00> : vector<8x128xf32>
    %19 = tpu.matmul %16, %17, %cst_16 {dimension_numbers = #tpu.dot_dimension_numbers<[1], [0], [0], [1], [0, 0, 1, 1], [], []>} : vector<8x128xf32>, vector<128x128xf32>, vector<8x128xf32> -> vector<8x128xf32>
    %20 = vector.broadcast %18 : vector<1x128xf32> to vector<8x128xf32>
    %21 = arith.addf %19, %20 : vector<8x128xf32>
    %c0_17 = arith.constant 0 : index
    %c0_18 = arith.constant 0 : index
    %22 = vector.load %arg7[%c0_17, %c0_18] : memref<8x128xf32, #tpu.memory_space<vmem>>, vector<8x128xf32>
    tpu.vector_store %arg7[%c0_17, %c0_18], %21 {strides = array<i32>} : memref<8x128xf32, #tpu.memory_space<vmem>>, vector<8x128xf32>,
    return
  }
}

</mosaic_0001>

<bundles_post_ra>
// kernel: _fused_forward.1
= control target key start
LH: loop header
LB: loop body
LE: loop exit
PB: predicated region body
PF: predicated region fallthrough
CT: control target
= control target key end

     0   :  { %12 = vsyncpa [#allocation3], 0  ;;  %s358_s0 = inlined_call_operand.vmem [shape: f32[8,128], index: 0, kind: input, shape index: {}]   ;;  %s359_s1 = inlined_call_operand.hbm [shape: f32[128,128], index: 1, kind: input, shape index: {}]   ;;  %s360_s2 = inlined_call_operand.vmem [shape: f32[1,128], index: 2, kind: input, shape index: {}]   ;;  %s361_s3 = inlined_call_operand.hbm [shape: f32[128,128], index: 3, kind: input, shape index: {}]   ;;  %s362_s4 = inlined_call_operand.vmem [shape: f32[1,128], index: 4, kind: input, shape index: {}]   ;;  %s363_s5 = inlined_call_operand.hbm [shape: f32[128,128], index: 5, kind: input, shape index: {}]   ;;  %s364_s6 = inlined_call_operand.vmem [shape: f32[1,128], index: 6, kind: input, shape index: {}]   ;;  %s365_s7 = inlined_call_operand.vmem [shape: f32[8,128], index: 7, kind: output, shape index: {}]  }
   0x1   :  { %13 = vsyncpa [#allocation5], 0  ;;  %s35_s26 = sshll.u32 %s361_s3, 4  ;;  %s289_s27 = smov [#allocation4]   ;;  %s36_s26 = int_to_ptr.hbm [resolvable:$true] %s35_s26 }
   0x2   :  { %s37_s28 = sshll.u32 %s289_s27, 4  ;;  %s20_s8 = sshll.u32 %s359_s1, 4  ;;  %s38_s28 = int_to_ptr.vmem [resolvable:$true] %s37_s28  ;;  %s21_s8 = int_to_ptr.hbm [resolvable:$true] %s20_s8 }
   0x3   :  { %s290_s9 = smov 128   ;;  %s291_s10 = smov 8  }
   0x4   :  { %43 = dma.hbm_to_vmem [thread:$0]  %s36_s26, 2048, %s38_s28, [#allocation5], %s290_s9, %s290_s9, %s291_s10  }
   0x5   :  { %s292_s11 = smov [#allocation2]   ;;  %s50_s15 = sshll.u32 %s363_s5, 4  ;;  %s51_s15 = int_to_ptr.hbm [resolvable:$true] %s50_s15 }
   0x6   :  { %s22_s12 = sshll.u32 %s292_s11, 4  ;;  %s293_s3 = smov [#allocation6]   ;;  %s23_s12 = int_to_ptr.vmem [resolvable:$true] %s22_s12 }
   0x7   :  { %28 = dma.hbm_to_vmem [thread:$0]  %s21_s8, 2048, %s23_s12, [#allocation3], %s290_s9, %s290_s9, %s291_s10  }
   0x8   :  { %s52_s16 = sshll.u32 %s293_s3, 4  ;;  %s53_s16 = int_to_ptr.vmem [resolvable:$true] %s52_s16 }
   0x9   :  { %58 = dma.hbm_to_vmem [thread:$0]  %s51_s15, 2048, %s53_s16, [#allocation5], %s290_s9, %s290_s9, %s291_s10  }
   0xa   :  { %285 = dma.done.wait [#allocation3], 2048  }
   0xb   :  { %286 = vsyncadd [#allocation3], 4294965248 }
   0xc   :  { %287 = dma.done.wait [#allocation5], 4096  }
   0xd   :  { %288 = vsyncadd [#allocation5], 4294963200  ;;  %v89_v0 = vld [vmem:[#allocation2 + $0x78] sm:$0xff]  ;;  %v88_v1 = vld [vmem:[#allocation2 + $0x70] sm:$0xff] }
   0xe   :  { %94 = vmatpush.msra.mxu0 %v89_v0  ;;  %v87_v2 = vld [vmem:[#allocation2 + $0x68] sm:$0xff]  ;;  %v86_v3 = vld [vmem:[#allocation2 + $0x60] sm:$0xff]  ;;  %v131_v4 = vld [vmem:[#allocation4 + $0x78] sm:$0xff] }
   0xf   :  { %v85_v5 = vld [vmem:[#allocation2 + $0x58] sm:$0xff]  ;;  %136 = vmatpush.msra.mxu1 %v131_v4  ;;  %v130_v6 = vld [vmem:[#allocation4 + $0x70] sm:$0xff]  ;;  %v129_v7 = vld [vmem:[#allocation4 + $0x68] sm:$0xff] }
  0x10   :  { %95 = vmatpush.msra.mxu0 %v88_v1  ;;  %v84_v8 = vld [vmem:[#allocation2 + $0x50] sm:$0xff]  ;;  %v128_v9 = vld [vmem:[#allocation4 + $0x60] sm:$0xff]  ;;  %v83_v10 = vld [vmem:[#allocation2 + $0x48] sm:$0xff] }
  0x11   :  { %137 = vmatpush.msra.mxu1 %v130_v6  ;;  %v127_v11 = vld [vmem:[#allocation4 + $0x58] sm:$0xff]  ;;  %v82_v12 = vld [vmem:[#allocation2 + $0x40] sm:$0xff]  ;;  %v126_v13 = vld [vmem:[#allocation4 + $0x50] sm:$0xff] }
  0x12   :  { %96 = vmatpush.msra.mxu0 %v87_v2  ;;  %v81_v14 = vld [vmem:[#allocation2 + $0x38] sm:$0xff]  ;;  %v125_v15 = vld [vmem:[#allocation4 + $0x48] sm:$0xff]  ;;  %v80_v16 = vld [vmem:[#allocation2 + $0x30] sm:$0xff] }
  0x13   :  { %138 = vmatpush.msra.mxu1 %v129_v7  ;;  %v124_v17 = vld [vmem:[#allocation4 + $0x40] sm:$0xff]  ;;  %v79_v18 = vld [vmem:[#allocation2 + $0x28] sm:$0xff]  ;;  %v123_v19 = vld [vmem:[#allocation4 + $0x38] sm:$0xff] }
  0x14   :  { %97 = vmatpush.msra.mxu0 %v86_v3  ;;  %v78_v20 = vld [vmem:[#allocation2 + $0x20] sm:$0xff]  ;;  %v122_v21 = vld [vmem:[#allocation4 + $0x30] sm:$0xff]  ;;  %v77_v22 = vld [vmem:[#allocation2 + $0x18] sm:$0xff] }
  0x15   :  { %139 = vmatpush.msra.mxu1 %v128_v9  ;;  %v121_v23 = vld [vmem:[#allocation4 + $0x28] sm:$0xff]  ;;  %v76_v24 = vld [vmem:[#allocation2 + $0x10] sm:$0xff]  ;;  %v120_v25 = vld [vmem:[#allocation4 + $0x20] sm:$0xff] }
  0x16   :  { %98 = vmatpush.msra.mxu0 %v85_v5  ;;  %v75_v26 = vld [vmem:[#allocation2 + $0x8] sm:$0xff]  ;;  %v74_v27 = vld [vmem:[#allocation2] sm:$0xff]  ;;  %v119_v29 = vld [vmem:[#allocation4 + $0x18] sm:$0xff] }
  0x17   :  { %140 = vmatpush.msra.mxu1 %v127_v11  ;;  %v73_v28 = vld [vmem:[%s358_s0] sm:$0xff]  ;;  %v118_v30 = vld [vmem:[#allocation4 + $0x10] sm:$0xff]  ;;  %v117_v31 = vld [vmem:[#allocation4 + $0x8] sm:$0xff] }
  0x18   :  { %99 = vmatpush.msra.mxu0 %v84_v8  ;;  %v116_v32 = vld [vmem:[#allocation4] sm:$0xff]  ;;  %v173_v33 = vld [vmem:[#allocation6 + $0x78] sm:$0xff]  ;;  %v172_v34 = vld [vmem:[#allocation6 + $0x70] sm:$0xff] }
  0x19   :  { %141 = vmatpush.msra.mxu1 %v126_v13  ;;  %178 = vmatpush.msra.mxu2 %v173_v33  ;;  %v171_v35 = vld [vmem:[#allocation6 + $0x68] sm:$0xff]  ;;  %v170_v36 = vld [vmem:[#allocation6 + $0x60] sm:$0xff]  ;;  %v169_v37 = vld [vmem:[#allocation6 + $0x58] sm:$0xff] }
  0x1a   :  { %100 = vmatpush.msra.mxu0 %v83_v10  ;;  %v168_v38 = vld [vmem:[#allocation6 + $0x50] sm:$0xff]  ;;  %v167_v39 = vld [vmem:[#allocation6 + $0x48] sm:$0xff]  ;;  %v166_v40 = vld [vmem:[#allocation6 + $0x40] sm:$0xff] }
  0x1b   :  { %142 = vmatpush.msra.mxu1 %v125_v15  ;;  %179 = vmatpush.msra.mxu2 %v172_v34  ;;  %v165_v41 = vld [vmem:[#allocation6 + $0x38] sm:$0xff]  ;;  %v164_v42 = vld [vmem:[#allocation6 + $0x30] sm:$0xff]  ;;  %v163_v43 = vld [vmem:[#allocation6 + $0x28] sm:$0xff] }
  0x1c   :  { %101 = vmatpush.msra.mxu0 %v82_v12  ;;  %v162_v44 = vld [vmem:[#allocation6 + $0x20] sm:$0xff]  ;;  %v161_v50 = vld [vmem:[#allocation6 + $0x18] sm:$0xff]  ;;  %v160_v51 = vld [vmem:[#allocation6 + $0x10] sm:$0xff] }
  0x1d   :  { %143 = vmatpush.msra.mxu1 %v124_v17  ;;  %180 = vmatpush.msra.mxu2 %v171_v35  ;;  %v210_v45 = vld [vmem:[%s360_s2] ss:$0 sm:$0xff]  ;;  %v159_v52 = vld [vmem:[#allocation6 + $0x8] sm:$0xff] }
  0x1e   :  { %102 = vmatpush.msra.mxu0 %v81_v14  ;;  %v158_v53 = vld [vmem:[#allocation6] sm:$0xff] }
  0x1f   :  { %144 = vmatpush.msra.mxu1 %v123_v19  ;;  %181 = vmatpush.msra.mxu2 %v170_v36  ;;  %v211_v54 = vld [vmem:[%s362_s4] ss:$0 sm:$0xff] }
  0x20   :  { %103 = vmatpush.msra.mxu0 %v80_v16  ;;  %v212_v59 = vld [vmem:[%s364_s6] ss:$0 sm:$0xff] }
  0x21   :  { %145 = vmatpush.msra.mxu1 %v122_v21  ;;  %182 = vmatpush.msra.mxu2 %v169_v37 }
  0x22   :  { %104 = vmatpush.msra.mxu0 %v79_v18 }
  0x23   :  { %146 = vmatpush.msra.mxu1 %v121_v23  ;;  %183 = vmatpush.msra.mxu2 %v168_v38 }
  0x24   :  { %105 = vmatpush.msra.mxu0 %v78_v20 }
  0x25   :  { %147 = vmatpush.msra.mxu1 %v120_v25  ;;  %184 = vmatpush.msra.mxu2 %v167_v39 }
  0x26   :  { %106 = vmatpush.msra.mxu0 %v77_v22 }
  0x27   :  { %148 = vmatpush.msra.mxu1 %v119_v29  ;;  %185 = vmatpush.msra.mxu2 %v166_v40 }
  0x28   :  { %107 = vmatpush.msra.mxu0 %v76_v24 }
  0x29   :  { %149 = vmatpush.msra.mxu1 %v118_v30  ;;  %186 = vmatpush.msra.mxu2 %v165_v41 }
  0x2a   :  { %108 = vmatpush.msra.mxu0 %v75_v26 }
  0x2b   :  { %150 = vmatpush.msra.mxu1 %v117_v31  ;;  %187 = vmatpush.msra.mxu2 %v164_v42 }
  0x2c   :  { %109 = vmatpush.msra.mxu0 %v74_v27 }
  0x2d   :  { %110 = vmatmul.f32.vlgmr.msra.gmra.mxu0 %v73_v28  ;;  %151 = vmatpush.msra.mxu1 %v116_v32 }
  0x2e   :  { %188 = vmatpush.msra.mxu2 %v163_v43 }
  0x30   :  { %189 = vmatpush.msra.mxu2 %v162_v44 }
  0x32   :  { %190 = vmatpush.msra.mxu2 %v161_v50 }
  0x34   :  { %191 = vmatpush.msra.mxu2 %v160_v51 }
  0x36   :  { %192 = vmatpush.msra.mxu2 %v159_v52 }
  0x38   :  { %193 = vmatpush.msra.mxu2 %v158_v53 }
  0xaa   :  { %v111_v46 = vpop.f32.mrf.mxu0 }
  0xab   :  { %v112_v47 = vadd.f32 %v210_v45, %v111_v46 }
  0xad   :  { %v114_v48 = vmul.f32 0.1, %v112_v47 }
  0xaf   :  { %v115_v49 = vmax.f32 %v112_v47, %v114_v48 }
  0xb1   :  { %152 = vmatmul.f32.vlgmr.msra.gmra.mxu1 %v115_v49 }
 0x12e   :  { %v153_v55 = vpop.f32.mrf.mxu1 }
 0x12f   :  { %v154_v56 = vadd.f32 %v211_v54, %v153_v55 }
 0x131   :  { %v156_v57 = vmul.f32 0.1, %v154_v56 }
 0x133   :  { %v157_v58 = vmax.f32 %v154_v56, %v156_v57 }
 0x135   :  { %194 = vmatmul.f32.vlgmr.msra.gmra.mxu2 %v157_v58 }
 0x1b8   :  { %v195_v60 = vpop.f32.mrf.mxu2 }
 0x1b9   :  { %v196_v61 = vadd.f32 %v212_v59, %v195_v60 }
 0x1bb   :  { %198 = vst [vmem:[%s365_s7] sm:$0xff] %v196_v61 }
 0x1bc   :  { %203 = vsyncpa [#allocation3], 1 }
 0x1bd   :  { %204 = vsyncpa [#allocation5], 1 }

</bundles_post_ra>
